<compile_context>
chip_gen: v6e
topology: v6e:2x2x1
jax: 0.10.0
libtpu: 0.0.40
codegen_flags: <defaults>
</compile_context>

<pallas_src>
import functools

import jax
import jax.numpy as jnp
from jax.experimental import pallas as pl
from jax.experimental.pallas import tpu as pltpu


def _round_up(x, m):
    return ((x + m - 1) // m) * m


def _vision_mlp_kernel(x_ref, w1_ref, b1_ref, w2_ref, b2_ref, o_ref, acc_ref,
                       *, n_tokens, tn, inv_count):
    # x_ref  : [TB, TN, D_in] token tile of the embeddings (input dtype)
    # acc_ref: [TB, D_in]     f32 pooled-sum accumulator (VMEM scratch)
    t = pl.program_id(1)
    x = x_ref[...]

    @pl.when(t == 0)
    def _():
        acc_ref[...] = jnp.zeros_like(acc_ref)

    # A tile needs masking iff it contains the CLS token (t == 0) or runs
    # past the real token count (ragged last tile; its OOB rows hold
    # undefined data that must not reach the sum).
    needs_mask = jnp.logical_or(t == 0, (t + 1) * tn > n_tokens)

    @pl.when(needs_mask)
    def _():
        tok = t * tn + jax.lax.broadcasted_iota(jnp.int32, (1, tn, 1), 1)
        valid = jnp.logical_and(tok >= 1, tok < n_tokens)   # drop CLS + OOB
        xm = jnp.where(valid, x, jnp.zeros((), x.dtype))
        acc_ref[...] += jnp.sum(xm, axis=1, dtype=jnp.float32)

    @pl.when(jnp.logical_not(needs_mask))
    def _():
        # Interior tile: plain sum, no per-element select.
        # TODO(synk): on v7x, pre-reduce adjacent token pairs in bf16 before
        # the f32 convert+add if profiling shows the VALU stream binding.
        acc_ref[...] += jnp.sum(x, axis=1, dtype=jnp.float32)

    @pl.when(t == pl.num_programs(1) - 1)
    def _():
        # Mean over the (N-1) real tokens; cast to the weight dtype so the
        # MXU runs bf16 x bf16 when bf16 weights are supplied.
        pooled = (acc_ref[...] * inv_count).astype(w1_ref.dtype)   # [TB, D_in]
        h = jnp.dot(pooled, w1_ref[...], preferred_element_type=jnp.float32)
        h = jnp.maximum(h + b1_ref[...].astype(jnp.float32), 0.0)
        out = jnp.dot(h.astype(w2_ref.dtype), w2_ref[...],
                      preferred_element_type=jnp.float32)
        out = jnp.maximum(out + b2_ref[...].astype(jnp.float32), 0.0)
        o_ref[...] = out.astype(o_ref.dtype)


def vision_feature_mlp(vit_embeds, w1, b1, w2, b2, *, tb=None, tn=None):
    """vit_embeds: [B, N, D_in] -> [B, D_out].

    w1: [D_in, H], b1: [H], w2: [H, D_out], b2: [D_out].
    At real module scale (1024 -> 2048 -> 4096, N ~ 257) pass bf16
    embeddings/weights so the streamed x and resident weights are half-size.
    """
    B, N, D_in = vit_embeds.shape
    H = w1.shape[1]
    D_out = w2.shape[1]
    assert N >= 2, "need at least 2 tokens (CLS token is dropped before mean)"

    x_itemsize = jnp.dtype(vit_embeds.dtype).itemsize
    w_itemsize = jnp.dtype(w1.dtype).itemsize
    o_itemsize = x_itemsize
    # Packed-dtype sublane multiple: bf16/fp16 min tile is (16, 128).
    sub = 16 if x_itemsize < 4 else 8

    # Physical VMEM (128 MiB v5e/v6e, 64 MiB v7x); budget ~1/8 of it per
    # x buffer so the double-buffered stream + resident weights fit.
    try:
        vmem_cap = int(pltpu.get_tpu_info().vmem_capacity_bytes)
    except Exception:  # not on TPU / query unavailable
        vmem_cap = 128 << 20
    x_buf_budget = vmem_cap // 8

    # ---- tile selection (from the VMEM footprint, not from B/N) -----------
    if tn is None:
        tn = min(128, _round_up(N, sub))
    tn = max(sub, _round_up(tn, sub))

    if tb is None:
        per_row = tn * D_in * x_itemsize
        tb = max(sub, min(256, x_buf_budget // max(per_row, 1)))
        if B > sub:
            # Prefer >= 2 batch tiles so the "parallel" axis can shard
            # across v7x's two TensorCores.
            tb = min(tb, _round_up(pl.cdiv(B, 2), sub))
    if tb >= B:
        tb = B                       # one block covering the whole batch
    else:
        tb = max(sub, (tb // sub) * sub)

    grid = (pl.cdiv(B, tb), pl.cdiv(N, tn))

    # ---- VMEM budget --------------------------------------------------------
    # x double-buffered; weights/biases single-buffered (Buffered(1));
    # out double-buffered; f32 accumulator + f32 h/out intermediates.
    vmem_est = (2 * tb * tn * D_in * x_itemsize
                + (D_in * H + H * D_out + H + D_out) * w_itemsize
                + 2 * tb * D_out * o_itemsize
                + tb * D_in * 4
                + tb * (H + D_out) * 4)
    vmem_limit = int(min(max(vmem_est + (8 << 20), 32 << 20),
                         (vmem_cap * 85) // 100))
    # TODO(synk): for f32 weights at full module size on v7x (64 MiB VMEM),
    # keep w2 in HBM (memory_space=pl.ANY) and stream D_out chunks on the
    # final token step, or cast the weights to bf16 in the caller.

    cost = pl.CostEstimate(
        flops=B * N * D_in + 2 * B * (D_in * H + H * D_out),
        transcendentals=0,
        bytes_accessed=(B * N * D_in * x_itemsize
                        + (D_in * H + H * D_out + H + D_out) * w_itemsize
                        + B * D_out * o_itemsize),
    )

    kernel = functools.partial(_vision_mlp_kernel, n_tokens=N, tn=tn,
                               inv_count=1.0 / (N - 1))

    b1_2d = b1.reshape(1, H)
    b2_2d = b2.reshape(1, D_out)
    resident = pl.Buffered(1)   # constant index_map: fetched once, one buffer

    return pl.pallas_call(
        kernel,
        out_shape=jax.ShapeDtypeStruct((B, D_out), vit_embeds.dtype),
        grid_spec=pltpu.PrefetchScalarGridSpec(
            num_scalar_prefetch=0,
            grid=grid,
            in_specs=[
                # TODO(synk): consider pipeline_mode=pl.Buffered(3) on x if
                # profiling shows exposed DMA at batch-tile boundaries.
                pl.BlockSpec((tb, tn, D_in), lambda i, t: (i, t, 0)),     # x
                pl.BlockSpec((D_in, H), lambda i, t: (0, 0),
                             pipeline_mode=resident),                      # w1
                pl.BlockSpec((1, H), lambda i, t: (0, 0),
                             pipeline_mode=resident),                      # b1
                pl.BlockSpec((H, D_out), lambda i, t: (0, 0),
                             pipeline_mode=resident),                      # w2
                pl.BlockSpec((1, D_out), lambda i, t: (0, 0),
                             pipeline_mode=resident),                      # b2
            ],
            out_specs=pl.BlockSpec((tb, D_out), lambda i, t: (i, 0)),
            scratch_shapes=[pltpu.VMEM((tb, D_in), jnp.float32)],
        ),
        compiler_params=pltpu.CompilerParams(
            dimension_semantics=("parallel", "arbitrary"),
            vmem_limit_bytes=vmem_limit,
        ),
        cost_estimate=cost,
    )(vit_embeds, w1, b1_2d, w2, b2_2d)


def init_params(key, d_in, hidden, d_out, dtype=jnp.float32):
    """Deterministic PyTorch-style Linear init: U(-1/sqrt(fan_in), 1/sqrt(fan_in))."""
    k1, k2, k3, k4 = jax.random.split(key, 4)
    lim1 = 1.0 / jnp.sqrt(d_in)
    lim2 = 1.0 / jnp.sqrt(hidden)
    w1 = jax.random.uniform(k1, (d_in, hidden), dtype, -lim1, lim1)
    b1 = jax.random.uniform(k2, (hidden,), dtype, -lim1, lim1)
    w2 = jax.random.uniform(k3, (hidden, d_out), dtype, -lim2, lim2)
    b2 = jax.random.uniform(k4, (d_out,), dtype, -lim2, lim2)
    return w1, b1, w2, b2


def reference_forward(x, w1, b1, w2, b2):
    pooled = jnp.mean(x[:, 1:, :], axis=1)
    h = jnp.maximum(pooled @ w1 + b1, 0.0)
    return jnp.maximum(h @ w2 + b2, 0.0)


if __name__ == "__main__":
    # Small shapes consistent with the module's forward ([B, N, 1024] ->
    # [B, 4096] at full scale; scaled down here): [B, N, D_in] -> [B, D_out].
    D_IN, HIDDEN, D_OUT = 32, 64, 128
    key = jax.random.PRNGKey(0)
    kx1, kx2, kp = jax.random.split(key, 3)
    w1, b1, w2, b2 = init_params(kp, D_IN, HIDDEN, D_OUT)

    # Case 1: tiny batch (single batch tile); tn=8 so N=25 spans 4 token
    # tiles and exercises the CLS-masked, interior, and ragged-last paths.
    x1 = jax.random.normal(kx1, (2, 25, D_IN), dtype=jnp.float32)
    out1 = jax.block_until_ready(vision_feature_mlp(x1, w1, b1, w2, b2, tn=8))
    ref1 = reference_forward(x1, w1, b1, w2, b2)
    assert out1.shape == (2, D_OUT), out1.shape
    assert jnp.allclose(out1, ref1, atol=1e-4, rtol=1e-5), (
        float(jnp.max(jnp.abs(out1 - ref1))))

    # Case 2: ragged, unpadded batch tiling (B=20, tb=8 -> 3 batch tiles,
    # last one partially out of bounds; no wrapper-side padding anywhere).
    x2 = jax.random.normal(kx2, (20, 25, D_IN), dtype=jnp.float32)
    out2 = jax.block_until_ready(
        vision_feature_mlp(x2, w1, b1, w2, b2, tb=8, tn=8))
    ref2 = reference_forward(x2, w1, b1, w2, b2)
    assert out2.shape == (20, D_OUT), out2.shape
    assert jnp.allclose(out2, ref2, atol=1e-4, rtol=1e-5), (
        float(jnp.max(jnp.abs(out2 - ref2))))

    print("KERNEL_OK")
</pallas_src>

<mosaic_0001>
module attributes {stable_mosaic.version = 11 : i64} {
  func.func @_vision_mlp_kernel(%arg0: i32, %arg1: i32, %arg2: memref<2x8x32xf32, #tpu.memory_space<vmem>>, %arg3: memref<32x64xf32, #tpu.memory_space<vmem>>, %arg4: memref<1x64xf32, #tpu.memory_space<vmem>>, %arg5: memref<64x128xf32, #tpu.memory_space<vmem>>, %arg6: memref<1x128xf32, #tpu.memory_space<vmem>>, %arg7: memref<2x128xf32, #tpu.memory_space<vmem>>, %arg8: memref<2x32xf32, #tpu.memory_space<vmem>>) attributes {dimension_semantics = [#tpu.dimension_semantics<parallel>, #tpu.dimension_semantics<arbitrary>], iteration_bounds = array<i64: 1, 4>, scalar_prefetch = 0 : i64, scratch_operands = 1 : i64, tpu.core_type = #tpu.core_type<tc>, window_params = [{transform_indices = @transform_0, window_bounds = array<i64: 2, 8, 32>}, {pipeline_mode = #tpu.pipeline_mode<synchronous>, transform_indices = @transform_1, window_bounds = array<i64: 32, 64>}, {pipeline_mode = #tpu.pipeline_mode<synchronous>, transform_indices = @transform_2, window_bounds = array<i64: 1, 64>}, {pipeline_mode = #tpu.pipeline_mode<synchronous>, transform_indices = @transform_3, window_bounds = array<i64: 64, 128>}, {pipeline_mode = #tpu.pipeline_mode<synchronous>, transform_indices = @transform_4, window_bounds = array<i64: 1, 128>}, {transform_indices = @transform_5, window_bounds = array<i64: 2, 128>}]} {
    %c0 = arith.constant 0 : index
    %c0_0 = arith.constant 0 : index
    %c0_1 = arith.constant 0 : index
    %0 = vector.load %arg2[%c0, %c0_0, %c0_1] : memref<2x8x32xf32, #tpu.memory_space<vmem>>, vector<2x8x32xf32>
    %c0_i32 = arith.constant 0 : i32
    %1 = arith.cmpi eq, %arg1, %c0_i32 : i32
    %2 = arith.extui %1 : i1 to i32
    %c0_i32_2 = arith.constant 0 : i32
    %3 = arith.cmpi ne, %2, %c0_i32_2 : i32
    scf.if %3 {
      %cst = arith.constant 0.000000e+00 : f32
      %17 = vector.broadcast %cst : f32 to vector<2x32xf32>
      %c0_7 = arith.constant 0 : index
      %c0_8 = arith.constant 0 : index
      %18 = vector.load %arg8[%c0_7, %c0_8] : memref<2x32xf32, #tpu.memory_space<vmem>>, vector<2x32xf32>
      tpu.vector_store %arg8[%c0_7, %c0_8], %17 {strides = array<i32>} : memref<2x32xf32, #tpu.memory_space<vmem>>, vector<2x32xf32>,
    } else {
    }
    %c0_i32_3 = arith.constant 0 : i32
    %4 = arith.cmpi eq, %arg1, %c0_i32_3 : i32
    %c1_i32 = arith.constant 1 : i32
    %5 = arith.addi %arg1, %c1_i32 : i32
    %c8_i32 = arith.constant 8 : i32
    %6 = arith.muli %5, %c8_i32 : i32
    %c25_i32 = arith.constant 25 : i32
    %7 = arith.cmpi sgt, %6, %c25_i32 : i32
    %8 = arith.ori %4, %7 : i1
    %9 = arith.extui %8 : i1 to i32
    %c0_i32_4 = arith.constant 0 : i32
    %10 = arith.cmpi ne, %9, %c0_i32_4 : i32
    scf.if %10 {
      %c8_i32_7 = arith.constant 8 : i32
      %17 = arith.muli %arg1, %c8_i32_7 : i32
      %18 = tpu.iota {dimensions = array<i32: 1>} : vector<1x8x1xi32>
      %19 = vector.broadcast %17 : i32 to vector<1x8x1xi32>
      %20 = arith.addi %19, %18 : vector<1x8x1xi32>
      %c1_i32_8 = arith.constant 1 : i32
      %21 = vector.broadcast %c1_i32_8 : i32 to vector<1x8x1xi32>
      %22 = arith.cmpi sge, %20, %21 : vector<1x8x1xi32>
      %c25_i32_9 = arith.constant 25 : i32
      %23 = vector.broadcast %c25_i32_9 : i32 to vector<1x8x1xi32>
      %24 = arith.cmpi slt, %20, %23 : vector<1x8x1xi32>
      %25 = arith.andi %22, %24 : vector<1x8x1xi1>
      %cst = arith.constant 0.000000e+00 : f32
      %26 = vector.shape_cast %25 : vector<1x8x1xi1> to vector<1x8x1xi1>
      %27 = vector.broadcast %26 : vector<1x8x1xi1> to vector<2x8x32xi1>
      %28 = vector.broadcast %cst : f32 to vector<2x8x32xf32>
      %29 = arith.select %27, %0, %28 : vector<2x8x32xi1>, vector<2x8x32xf32>
      %c0_10 = arith.constant 0 : index
      %c0_11 = arith.constant 0 : index
      %30 = vector.load %arg8[%c0_10, %c0_11] : memref<2x32xf32, #tpu.memory_space<vmem>>, vector<2x32xf32>
      %cst_12 = arith.constant dense<0.000000e+00> : vector<2x32xf32>
      %31 = vector.multi_reduction <add>, %29, %cst_12 [1] : vector<2x8x32xf32> to vector<2x32xf32>
      %32 = arith.addf %30, %31 : vector<2x32xf32>
      %c0_13 = arith.constant 0 : index
      %c0_14 = arith.constant 0 : index
      %33 = vector.load %arg8[%c0_13, %c0_14] : memref<2x32xf32, #tpu.memory_space<vmem>>, vector<2x32xf32>
      tpu.vector_store %arg8[%c0_13, %c0_14], %32 {strides = array<i32>} : memref<2x32xf32, #tpu.memory_space<vmem>>, vector<2x32xf32>,
    } else {
    }
    %true = arith.constant true
    %11 = arith.xori %8, %true : i1
    %12 = arith.extui %11 : i1 to i32
    %c0_i32_5 = arith.constant 0 : i32
    %13 = arith.cmpi ne, %12, %c0_i32_5 : i32
    scf.if %13 {
      %c0_7 = arith.constant 0 : index
      %c0_8 = arith.constant 0 : index
      %17 = vector.load %arg8[%c0_7, %c0_8] : memref<2x32xf32, #tpu.memory_space<vmem>>, vector<2x32xf32>
      %cst = arith.constant dense<0.000000e+00> : vector<2x32xf32>
      %18 = vector.multi_reduction <add>, %0, %cst [1] : vector<2x8x32xf32> to vector<2x32xf32>
      %19 = arith.addf %17, %18 : vector<2x32xf32>
      %c0_9 = arith.constant 0 : index
      %c0_10 = arith.constant 0 : index
      %20 = vector.load %arg8[%c0_9, %c0_10] : memref<2x32xf32, #tpu.memory_space<vmem>>, vector<2x32xf32>
      tpu.vector_store %arg8[%c0_9, %c0_10], %19 {strides = array<i32>} : memref<2x32xf32, #tpu.memory_space<vmem>>, vector<2x32xf32>,
    } else {
    }
    %c3_i32 = arith.constant 3 : i32
    %14 = arith.cmpi eq, %arg1, %c3_i32 : i32
    %15 = arith.extui %14 : i1 to i32
    %c0_i32_6 = arith.constant 0 : i32
    %16 = arith.cmpi ne, %15, %c0_i32_6 : i32
    scf.if %16 {
      %c0_7 = arith.constant 0 : index
      %c0_8 = arith.constant 0 : index
      %17 = vector.load %arg8[%c0_7, %c0_8] : memref<2x32xf32, #tpu.memory_space<vmem>>, vector<2x32xf32>
      %cst = arith.constant 0.0416666679 : f32
      %18 = vector.broadcast %cst : f32 to vector<2x32xf32>
      %19 = arith.mulf %17, %18 : vector<2x32xf32>
      %c0_9 = arith.constant 0 : index
      %c0_10 = arith.constant 0 : index
      %20 = vector.load %arg3[%c0_9, %c0_10] : memref<32x64xf32, #tpu.memory_space<vmem>>, vector<32x64xf32>
      %cst_11 = arith.constant dense<0.000000e+00> : vector<2x64xf32>
      %21 = tpu.matmul %19, %20, %cst_11 {dimension_numbers = #tpu.dot_dimension_numbers<[1], [0], [0], [1], [0, 0, 1, 1], [], []>} : vector<2x32xf32>, vector<32x64xf32>, vector<2x64xf32> -> vector<2x64xf32>
      %c0_12 = arith.constant 0 : index
      %c0_13 = arith.constant 0 : index
      %22 = vector.load %arg4[%c0_12, %c0_13] : memref<1x64xf32, #tpu.memory_space<vmem>>, vector<1x64xf32>
      %23 = vector.broadcast %22 : vector<1x64xf32> to vector<2x64xf32>
      %24 = arith.addf %21, %23 : vector<2x64xf32>
      %cst_14 = arith.constant 0.000000e+00 : f32
      %25 = vector.broadcast %cst_14 : f32 to vector<2x64xf32>
      %26 = arith.maximumf %24, %25 : vector<2x64xf32>
      %c0_15 = arith.constant 0 : index
      %c0_16 = arith.constant 0 : index
      %27 = vector.load %arg5[%c0_15, %c0_16] : memref<64x128xf32, #tpu.memory_space<vmem>>, vector<64x128xf32>
      %cst_17 = arith.constant dense<0.000000e+00> : vector<2x128xf32>
      %28 = tpu.matmul %26, %27, %cst_17 {dimension_numbers = #tpu.dot_dimension_numbers<[1], [0], [0], [1], [0, 0, 1, 1], [], []>} : vector<2x64xf32>, vector<64x128xf32>, vector<2x128xf32> -> vector<2x128xf32>
      %c0_18 = arith.constant 0 : index
      %c0_19 = arith.constant 0 : index
      %29 = vector.load %arg6[%c0_18, %c0_19] : memref<1x128xf32, #tpu.memory_space<vmem>>, vector<1x128xf32>
      %30 = vector.broadcast %29 : vector<1x128xf32> to vector<2x128xf32>
      %31 = arith.addf %28, %30 : vector<2x128xf32>
      %cst_20 = arith.constant 0.000000e+00 : f32
      %32 = vector.broadcast %cst_20 : f32 to vector<2x128xf32>
      %33 = arith.maximumf %31, %32 : vector<2x128xf32>
      %c0_21 = arith.constant 0 : index
      %c0_22 = arith.constant 0 : index
      %34 = vector.load %arg7[%c0_21, %c0_22] : memref<2x128xf32, #tpu.memory_space<vmem>>, vector<2x128xf32>
      tpu.vector_store %arg7[%c0_21, %c0_22], %33 {strides = array<i32>} : memref<2x128xf32, #tpu.memory_space<vmem>>, vector<2x128xf32>,
    } else {
    }
    return
  }
  func.func @transform_0(%arg0: i32, %arg1: i32) -> (i32, i32, i32) {
    %c0_i32 = arith.constant 0 : i32
    %c0_i32_0 = arith.constant 0 : i32
    return %arg0, %arg1, %c0_i32 : i32, i32, i32
  }
  func.func @transform_1(%arg0: i32, %arg1: i32) -> (i32, i32) {
    %c0_i32 = arith.constant 0 : i32
    %c0_i32_0 = arith.constant 0 : i32
    %c0_i32_1 = arith.constant 0 : i32
    return %c0_i32, %c0_i32_0 : i32, i32
  }
  func.func @transform_2(%arg0: i32, %arg1: i32) -> (i32, i32) {
    %c0_i32 = arith.constant 0 : i32
    %c0_i32_0 = arith.constant 0 : i32
    %c0_i32_1 = arith.constant 0 : i32
    return %c0_i32, %c0_i32_0 : i32, i32
  }
  func.func @transform_3(%arg0: i32, %arg1: i32) -> (i32, i32) {
    %c0_i32 = arith.constant 0 : i32
    %c0_i32_0 = arith.constant 0 : i32
    %c0_i32_1 = arith.constant 0 : i32
    return %c0_i32, %c0_i32_0 : i32, i32
  }
  func.func @transform_4(%arg0: i32, %arg1: i32) -> (i32, i32) {
    %c0_i32 = arith.constant 0 : i32
    %c0_i32_0 = arith.constant 0 : i32
    %c0_i32_1 = arith.constant 0 : i32
    return %c0_i32, %c0_i32_0 : i32, i32
  }
  func.func @transform_5(%arg0: i32, %arg1: i32) -> (i32, i32) {
    %c0_i32 = arith.constant 0 : i32
    %c0_i32_0 = arith.constant 0 : i32
    return %arg0, %c0_i32 : i32, i32
  }
}

</mosaic_0001>

<bundles_post_ra>
// kernel: tpu_custom_call.1
= control target key start
LH: loop header
LB: loop body
LE: loop exit
PB: predicated region body
PF: predicated region fallthrough
CT: control target
= control target key end

     0   :  { %10 = vsyncpa [#allocation5], 0  ;;  %s818_s18 = smov 0   ;;  %s820_s19 = smov 0   ;;  %s955_s0 = inlined_call_operand.vmem [shape: f32[2,25,32], index: 0, kind: input, shape index: {}]   ;;  %s956_s1 = inlined_call_operand.vmem [shape: f32[32,64], index: 1, kind: input, shape index: {}]   ;;  %s957_s2 = inlined_call_operand.vmem [shape: f32[1,64], index: 2, kind: input, shape index: {}]   ;;  %s958_s3 = inlined_call_operand.vmem [shape: f32[64,128], index: 3, kind: input, shape index: {}]   ;;  %s959_s4 = inlined_call_operand.vmem [shape: f32[1,128], index: 4, kind: input, shape index: {}]   ;;  %s960_s5 = inlined_call_operand.hbm [shape: f32[2,128], index: 5, kind: output, shape index: {}]  }
   0x1   :  { %s822_s20 = smov 0   ;;  %s824_s21 = smov 0  }
   0x2   :  { %s826_s22 = smov 0  }
   0x3 LB: > { %s601_s23 = sadd.s32 4294967295, %s782_s22   ;;  %s25_s24 = sadd.s32 1, %s778_s21  ;;  %s782_s22 = sphi %s826_s22, %s16_s22   ;;  %s778_s21 = sphi %s824_s21, %s966_s21   ;;  %s774_s20 = sphi %s822_s20, %s965_s20   ;;  %s770_s19 = sphi %s820_s19, %s964_s19   ;;  %s766_s18 = sphi %s818_s18, %s963_s18  }
   0x4   : > { %p26_p0 = scmp.ge.s32.totalorder %s25_s24, 4  ;;  %p44_p1 = scmp.ne.s32.totalorder %s770_s19, %s766_s18 }
   0x5   : > { %p45_p2 = scmp.eq.s32.totalorder %s782_s22, 0  ;;  %s37_s26 = sadd.s32 1, %s770_s19 }
   0x6   : > { %s968_s24 = smov (%p26_p0, %s25_s24), 0  ;;  %p603_p5 = scmp.ge.s32.totalorder %s782_s22, 4 }
   0x7   : > { %p46_p3 = por %p45_p2, %p44_p1  ;;  %s33_s25 = ssub.s32 %s778_s21, %s968_s24 }
   0x8   : > { %p35_p4 = scmp.eq.s32.totalorder %s33_s25, 0  ;;  %192 = sbr.rel (%p603_p5) target bundleno = 19 (0x13), region = 32 }
   0xa   : > { %s854_s27 = scalar_select %p35_p4, %s770_s19, %s37_s26  }
   0xd   : > { %195 = sbr.rel (!%p46_p3) target bundleno = 19 (0x13), region = 36  ;;  %s197_s28 = sand.u32 (%p46_p3), 1, %s770_s19  }
   0xe   : > { %s605_s29 = sshll.u32 (%p46_p3), %s778_s21, 3  ;;  %s604_s30 = sshll.u32 (%p46_p3), %s197_s28, 4 }
   0xf   : > { %s204_s8 = scalar_lea.vmem (%p46_p3), %s955_s0, %s605_s29  ;;  %s199_s9 = scalar_lea.vmem (%p46_p3), [#allocation3], %s604_s30 }
  0x10   : > { %v235_v0 = vld [vmem:[%s204_s8] sm:$0xff] (%p46_p3) }
  0x11   : > { %v237_v1 = vld [vmem:[%s204_s8 + $0x20] sm:$0xff] (%p46_p3)  ;;  %236 = vst [vmem:[%s199_s9] sm:$0xff] (%p46_p3), %v235_v0 }
  0x12   : > { %238 = vst [vmem:[%s199_s9 + $0x8] sm:$0xff] %v237_v1 }
  0x13 PF: > { %p606_p6 = scmp.ge.s32.totalorder %s782_s22, 1  ;;  %p243_p7 = scmp.lt.s32.totalorder %s782_s22, 5 }
  0x15   : > { %p244_p8 = pnand %p606_p6, %p243_p7 }
  0x16   : > { %s250_s10 = sand.u32 (!%p244_p8), 1, %s766_s18   ;;  %p275_p9 = scmp.eq.s32.totalorder (!%p244_p8), %s774_s20, 0 }
  0x17   : > { %247 = sbr.rel (%p244_p8) target bundleno = 515 (0x203), region = 74  ;;  %s607_s11 = sshll.u32 (!%p244_p8), %s250_s10, 4 }
  0x18   : > { %s252_s12 = scalar_lea.vmem (!%p244_p8), [#allocation3], %s607_s11  ;;  %p608_p10 = scmp.ne.s32.totalorder (!%p244_p8), %s774_s20, 0 }
  0x1c   : > { %v273_v2 = vld [vmem:[%s252_s12] sm:$0xff]  ;;  %v274_v3 = vld [vmem:[%s252_s12 + $0x8] sm:$0xff]  ;;  %278 = sbr.rel (%p608_p10) target bundleno = 35 (0x23), region = 82 }
  0x21   : > { %vm279_vm0 = vcmask 254976   ;;  %v784_v4 = vmov 0.0  }
  0x22   : > { %280 = vst.msk [vmem:[#allocation2] sm:$0x3] %vm279_vm0, %v784_v4 }
  0x23 PF: > { %s620_s13 = sshll.u32 %s774_s20, 3 }
  0x24   : > { %s621_s14 = sadd.s32 8, %s620_s13 }
  0x25   : > { %p283_p11 = scmp.gt.s32.totalorder %s621_s14, 25 }
  0x27   : > { %p870_p12 = por %p283_p11, %p275_p9 }
  0x28   : > { %v289_v5 = vlaneseq (%p870_p12)  ;;  %v291_v6 = vstv (%p870_p12), %s620_s13  ;;  %vm301_vm3 = vcmask (%p870_p12), 261120   ;;  %vm318_vm5 = vcmask (%p870_p12), 1041409  }
  0x29   : > { %287 = sbr.rel (!%p870_p12) target bundleno = 66 (0x42), region = 86  ;;  %v300_v23 = vld [vmem:[#allocation2] sm:$0x3] (%p870_p12)  ;;  %vm322_vm6 = vcmask (%p870_p12), 254976  }
  0x2a   : > { %v290_v7 = vshrl.u32 (%p870_p12), %v289_v5, 7 }
  0x2c   : > { %v292_v8 = vadd.s32 (%p870_p12), %v291_v6, %v290_v7 }
  0x2e   : > { %vm293_vm1 = vcmp.ge.s32.totalorder %v292_v8, 1  ;;  %vm294_vm2 = vcmp.lt.s32.totalorder %v292_v8, 25 }
  0x2f   : > { %vm295_vm4 = vmand %vm293_vm1, %vm294_vm2 }
  0x30   : > { %v298_v9 = vsel %vm295_vm4, %v273_v2, 0.0  ;;  %v299_v10 = vsel %vm295_vm4, %v274_v3, 0.0 }
  0x31   : > { %v302_v11 = vsel %vm301_vm3, %v298_v9, 0.0  ;;  %v309_v12 = vsel %vm301_vm3, %v299_v10, 0.0 }
  0x32   : > { %v303_v13 = vrot.slane %v302_v11, 4  ;;  %v310_v14 = vrot.slane %v309_v12, 4 }
  0x34   : > { %v304_v15 = vadd.f32 %v303_v13, %v302_v11  ;;  %v311_v16 = vadd.f32 %v310_v14, %v309_v12 }
  0x36   : > { %v305_v17 = vrot.slane %v304_v15, 2  ;;  %v312_v18 = vrot.slane %v311_v16, 2 }
  0x38   : > { %v306_v19 = vadd.f32 %v305_v17, %v304_v15  ;;  %v313_v20 = vadd.f32 %v312_v18, %v311_v16 }
  0x3a   : > { %v307_v21 = vrot.slane %v306_v19, 1  ;;  %v314_v22 = vrot.slane %v313_v20, 1 }
  0x3c   : > { %v308_v24 = vadd.f32 %v307_v21, %v306_v19  ;;  %v315_v25 = vadd.f32 %v314_v22, %v313_v20 }
  0x3e   : > { %v319_v26 = vsel %vm318_vm5, %v315_v25, %v308_v24 }
  0x3f   : > { %v321_v27 = vadd.f32 %v319_v26, %v300_v23 }
  0x41   : > { %323 = vst.msk [vmem:[#allocation2] sm:$0x3] %vm322_vm6, %v321_v27 }
  0x42 PF: > { %326 = sbr.rel (%p870_p12) target bundleno = 89 (0x59), region = 90 }
  0x47   : > { %vm328_vm7 = vcmask 261120   ;;  %vm345_vm8 = vcmask 1041409   ;;  %vm349_vm9 = vcmask 254976  }
  0x48   : > { %v329_v28 = vsel %vm328_vm7, %v273_v2, 0.0  ;;  %v336_v29 = vsel %vm328_vm7, %v274_v3, 0.0  ;;  %v327_v40 = vld [vmem:[#allocation2] sm:$0x3] }
  0x49   : > { %v330_v30 = vrot.slane %v329_v28, 4  ;;  %v337_v31 = vrot.slane %v336_v29, 4 }
  0x4b   : > { %v331_v32 = vadd.f32 %v330_v30, %v329_v28  ;;  %v338_v33 = vadd.f32 %v337_v31, %v336_v29 }
  0x4d   : > { %v332_v34 = vrot.slane %v331_v32, 2  ;;  %v339_v35 = vrot.slane %v338_v33, 2 }
  0x4f   : > { %v333_v36 = vadd.f32 %v332_v34, %v331_v32  ;;  %v340_v37 = vadd.f32 %v339_v35, %v338_v33 }
  0x51   : > { %v334_v38 = vrot.slane %v333_v36, 1  ;;  %v341_v39 = vrot.slane %v340_v37, 1 }
  0x53   : > { %v335_v41 = vadd.f32 %v334_v38, %v333_v36  ;;  %v342_v42 = vadd.f32 %v341_v39, %v340_v37 }
  0x55   : > { %v346_v43 = vsel %vm345_vm8, %v342_v42, %v335_v41 }
  0x56   : > { %v348_v44 = vadd.f32 %v346_v43, %v327_v40 }
  0x58   : > { %350 = vst.msk [vmem:[#allocation2] sm:$0x3] %vm349_vm9, %v348_v44 }
  0x59 PF: > { %p611_p13 = scmp.ne.s32.totalorder %s774_s20, 3 }
  0x5b   : > { %354 = sbr.rel (%p611_p13) target bundleno = 500 (0x1f4), region = 94 }
  0x60   : > { %v360_v45 = vld [vmem:[%s956_s1 + $0x18] sm:$0xff]  ;;  %v785_v46 = vmov 0.0   ;;  %v359_v47 = vld [vmem:[%s956_s1 + $0x10] sm:$0xff]  ;;  %vm786_vm10 = vmmov 0   ;;  %v355_v49 = vld [vmem:[#allocation2] sm:$0x3] }
  0x61   : > { %636 = vmatprep.subr.mxu0 %v785_v46  ;;  %644 = vmatprep.mubr.msk.f32.mxu0 %vm786_vm10, %v785_v46  ;;  %v450_v48 = vld [vmem:[%s958_s3 + $0x38] sm:$0xff]  ;;  %v449_v50 = vld [vmem:[%s958_s3 + $0x30] sm:$0xff]  ;;  %v358_v51 = vld [vmem:[%s956_s1 + $0x8] sm:$0xff]  ;;  %v356_v54 = vmul.f32 0.041666668, %v355_v49  ;;  %vm368_vm11 = vcmask 261120  }
  0x62   : > { %637 = vmatpush3.msra.mxu0 %v360_v45  ;;  %647 = vmatprep.subr.mxu1 %v785_v46  ;;  %v448_v52 = vld [vmem:[%s958_s3 + $0x28] sm:$0xff]  ;;  %v357_v53 = vld [vmem:[%s956_s1] sm:$0xff]  ;;  %v446_v56 = vld [vmem:[%s958_s3 + $0x18] sm:$0xff]  ;;  %vm458_vm12 = vcmask 523264  }
  0x63   : > { %638 = vmatprep.subr.mxu0 %v785_v46  ;;  %648 = vmatpush3.msra.mxu1 %v450_v48  ;;  %v447_v55 = vld [vmem:[%s958_s3 + $0x20] sm:$0xff]  ;;  %v445_v57 = vld [vmem:[%s958_s3 + $0x10] sm:$0xff]  ;;  %v444_v58 = vld [vmem:[%s958_s3 + $0x8] sm:$0xff] }
  0x64   : > { %639 = vmatpush3.msra.mxu0 %v359_v47  ;;  %649 = vmatprep.subr.mxu1 %v785_v46  ;;  %v443_v59 = vld [vmem:[%s958_s3] sm:$0xff] }
  0x65   : > { %640 = vmatprep.subr.mxu0 %v785_v46  ;;  %650 = vmatpush3.msra.mxu1 %v449_v50  ;;  %v612_v60 = vld [vmem:[%s957_s2] ss:$0 sm:$0xff] }
  0x66   : > { %641 = vmatpush3.msra.mxu0 %v358_v51  ;;  %651 = vmatprep.subr.mxu1 %v785_v46  ;;  %v614_v1 = vld [vmem:[%s959_s4] ss:$0 sm:$0xff] }
  0x67   : > { %642 = vmatprep.subr.mxu0 %v785_v46  ;;  %652 = vmatpush3.msra.mxu1 %v448_v52 }
  0x68   : > { %643 = vmatpush3.msra.mxu0 %v357_v53  ;;  %653 = vmatprep.subr.mxu1 %v785_v46 }
  0x69   : > { %645 = vmatmul.mubr.msk.f32.vlgmr.msra.gmra.mxu0 %vm368_vm11, %v356_v54  ;;  %654 = vmatpush3.msra.mxu1 %v447_v55 }
  0x6a   : > { %655 = vmatprep.subr.mxu1 %v785_v46  ;;  %663 = vmatprep.mubr.msk.f32.mxu1 %vm786_vm10, %v785_v46 }
  0x6b   : > { %656 = vmatpush3.msra.mxu1 %v446_v56 }
  0x6c   : > { %657 = vmatprep.subr.mxu1 %v785_v46 }
  0x6d   : > { %658 = vmatpush3.msra.mxu1 %v445_v57 }
  0x6e   : > { %659 = vmatprep.subr.mxu1 %v785_v46 }
  0x6f   : > { %660 = vmatpush3.msra.mxu1 %v444_v58 }
  0x70   : > { %661 = vmatprep.subr.mxu1 %v785_v46 }
  0x71   : > { %662 = vmatpush3.msra.mxu1 %v443_v59 }
 0x129   : > { %v438_v61 = vpop.f32.mrf.mxu0 }
 0x12a   : > { %v439_v62 = vadd.f32 %v612_v60, %v438_v61 }
 0x12b   : > { %v646_v63 = vpop.f32.mrf.mxu0 }
 0x12c   : > { %v442_v0 = vmax.f32 %v439_v62, 0.0 }
 0x12e   : > { %664 = vmatmul.mubr.msk.f32.vlgmr.msra.gmra.mxu1 %vm458_vm12, %v442_v0 }
 0x1ee   : > { %v528_v2 = vpop.f32.mrf.mxu1 }
 0x1ef   : > { %v529_v3 = vadd.f32 %v614_v1, %v528_v2 }
 0x1f0   : > { %v665_v4 = vpop.f32.mrf.mxu1 }
 0x1f1   : > { %v532_v5 = vmax.f32 %v529_v3, 0.0 }
 0x1f3   : > { %533 = vst [vmem:[#allocation4] sm:$0x3] %v532_v5 }
 0x1f4 PF: > { %p925_p0 = scmp.eq.s32.totalorder %s601_s23, 3  ;;  %s787_s7 = smov [#allocation4]  }
 0x1f5   : > { %s543_s8 = sshll.u32 %s787_s7, 4  ;;  %s544_s8 = int_to_ptr.vmem [resolvable:$true] %s543_s8 }
 0x1f6   : > { %s716_s9 = scalar_lea.vmem %s544_s8, 32  ;;  %p723_p4 = scmp.lt.s32.totalorder %s544_s8, %s544_s8 }
 0x1f7   : > { %p717_p1 = scmp.ne.s32.totalorder %s544_s8, %s716_s9  ;;  %p724_p5 = scmp.lt.s32.totalorder %s716_s9, %s716_s9 }
 0x1f9   : > { %p718_p2 = pnand %p717_p1, %p925_p0  ;;  %p725_p6 = por %p724_p5, %p723_p4 }
 0x1fb   : > { %p719_p3 = pneg %p718_p2 }
 0x1fd   : > { %p726_p7 = pnand %p725_p6, %p719_p3 }
 0x1ff   : > { %729 = shalt.err (!%p726_p7)
}
 0x200   : > { %667 = dma.vmem_to_hbm [thread:$0]  (%p925_p0), %s544_s8, 32, %s960_s5, [#allocation5]  }
 0x201   : > { %761 = dma.done.wait (%p925_p0), [#allocation5], 32  }
 0x202   : > { %763 = vsyncadd (%p925_p0), [#allocation5], 4294967264 }
 0x203 PF: > { %s16_s22 = sadd.s32 1, %s782_s22   ;;  %s963_s18 = smov %s770_s19 }
 0x204   : > { %p13_p8 = scmp.ge.s32.totalorder %s16_s22, 6   ;;  %s964_s19 = smov %s854_s27 }
 0x205   : > { %s965_s20 = smov %s778_s21  ;;  %s966_s21 = smov %s968_s24 }
 0x206   :  { %15 = sbr.rel (!%p13_p8) target bundleno = 3 (0x3), region = 127 }
 0x20b   :  { %556 = vsyncpa [#allocation5], 1 }
 0x20c   :  { %558 = vsyncpa [#allocation5 + $0x1], 1 }

</bundles_post_ra>
